<compile_context>
chip_gen: v5e
topology: v5e:2x2
jax: 0.10.0
libtpu: 0.0.40
codegen_flags: <defaults>
</compile_context>

<pallas_src>
import functools
import math

import jax
import jax.numpy as jnp
from jax.experimental import pallas as pl
from jax.experimental.pallas import tpu as pltpu


def _round_up(a, m):
    return (a + m - 1) // m * m


# ----------------------------------------------------------------------------- kernel
def _stl_kernel(xp_ref, trend_ref, seasonal_ref, *, periods, front_pad, tl):
    """Fused STL decomposition for all periods, one (lane-tile, time-tile) block.

    xp_ref      : (Lp, tc)      max edge-padded input, full (padded) time axis
    trend_ref   : (K, tl, tc)   per-period trend for this time tile
    seasonal_ref: (K, tl, tc)   per-period seasonal residual for this time tile
    """
    ti = pl.program_id(1)
    base = ti * tl + front_pad
    if front_pad % 8 == 0 and tl % 8 == 0:
        base = pl.multiple_of(base, 8)          # sublane-aligned base row

    def tap(off):
        # One shifted view of the padded slab: plain sublane-offset vector load.
        return xp_ref[pl.ds(base + off, tl), :].astype(jnp.float32)

    x = tap(0)                                  # original series at the output rows

    # Periods sorted ascending: each centered window is a superset of the
    # previous one, so the accumulator is reused and only the new edge taps
    # are added per period.
    order = sorted(range(len(periods)), key=lambda i: periods[i])
    acc = None
    lo, hi = 1, 0                               # covered tap-offset range (empty)
    for idx in order:
        p = periods[idx]
        f = p - 1 - (p - 1) // 2                # taps before t
        e = (p - 1) // 2                        # taps after t
        for o in range(-f, e + 1):
            if lo <= o <= hi:
                continue                        # already accumulated
            t = x if o == 0 else tap(o)
            acc = t if acc is None else acc + t
        lo, hi = -f, e
        trend = acc * (1.0 / float(p))
        trend_ref[idx] = trend.astype(trend_ref.dtype)
        seasonal_ref[idx] = (x - trend).astype(seasonal_ref.dtype)


# ----------------------------------------------------------------------------- wrapper
def stl_decompose_forward(x, periods, *, max_time_tile=512):
    """x: (B, L, C) float32 -> (trends, seasonals), each a list of (B, L, C)."""
    b, l, c = x.shape
    periods = tuple(int(p) for p in periods)
    k = len(periods)
    bc = b * c

    # Per-period replicate-pad widths; the kernel works off one max-padded slab
    # (edge replication makes the wider pad consistent with every narrower one).
    fronts = [p - 1 - (p - 1) // 2 for p in periods]
    ends = [(p - 1) // 2 for p in periods]
    front = _round_up(max(fronts), 8)           # 8-aligned -> aligned in-kernel slices
    end = max(ends)

    # ---- lane axis: (batch*channel), padded to a multiple of 128 (lane-dense stores)
    bcp = _round_up(bc, 128)
    tc = bcp
    if bcp >= 256:                              # split so both v7x TensorCores get work
        for cand in (512, 256, 128):
            if bcp % cand == 0 and bcp // cand >= 2:
                tc = cand
                break

    # ---- time axis tiling (software pipelining + bounded per-step VMEM)
    if l <= max_time_tile:
        tl = l
        l_pad = l
    else:
        tl = max_time_tile                      # multiple of 8
        l_pad = _round_up(l, tl)
    end_total = end + (l_pad - l)               # extra edge rows cover padded tiles
    lp = front + l + end_total

    # Time on sublanes, (batch*channel) on lanes; single max-padded slab.
    xt = jnp.transpose(x, (1, 0, 2)).reshape(l, bc)
    if bcp != bc:
        xt = jnp.pad(xt, ((0, 0), (0, bcp - bc)))
    xp = jnp.pad(xt, ((front, end_total), (0, 0)), mode="edge")   # (lp, bcp)

    grid = (bcp // tc, l_pad // tl)
    kernel = functools.partial(_stl_kernel, periods=periods, front_pad=front, tl=tl)

    # TODO(synk): for extremely long sequences the full-time input block may not fit
    # VMEM; that regime needs a manual halo DMA (memory_space=pl.ANY) per time tile.
    trends, seasonals = pl.pallas_call(
        kernel,
        out_shape=(jax.ShapeDtypeStruct((k, l_pad, bcp), jnp.float32),
                   jax.ShapeDtypeStruct((k, l_pad, bcp), jnp.float32)),
        grid=grid,
        in_specs=[
            # Full (padded) time axis per lane tile; the block index is constant
            # across the inner time axis, so the slab is fetched once per lane tile.
            pl.BlockSpec((lp, tc), lambda g, t: (0, g)),
        ],
        out_specs=(
            pl.BlockSpec((k, tl, tc), lambda g, t: (0, t, g)),
            pl.BlockSpec((k, tl, tc), lambda g, t: (0, t, g)),
        ),
        compiler_params=pltpu.CompilerParams(
            dimension_semantics=("parallel", "arbitrary"),
            vmem_limit_bytes=64 * 1024 * 1024),
    )(xp)

    # (K, L_pad, BCp) -> per-period (B, L, C).  Kept only to match the module's
    # output contract; consumers that can take the stacked layout should skip it.
    trends = trends[:, :l, :bc].reshape(k, l, b, c).transpose(0, 2, 1, 3)
    seasonals = seasonals[:, :l, :bc].reshape(k, l, b, c).transpose(0, 2, 1, 3)
    return [trends[i] for i in range(k)], [seasonals[i] for i in range(k)]


# ----------------------------------------------------------------------------- pure-JAX reference
def _ref_stl(x, periods):
    """Direct transcription of moving_avg / STLDecompose.forward."""
    b, l, c = x.shape
    trends, seasonals = [], []
    for p in periods:
        f = p - 1 - math.floor((p - 1) // 2)
        e = math.floor((p - 1) // 2)
        front = jnp.repeat(x[:, :1, :], f, axis=1)
        end = jnp.repeat(x[:, -1:, :], e, axis=1)
        xp = jnp.concatenate([front, x, end], axis=1)           # (B, L+p-1, C)
        idx = jnp.arange(l)[:, None] + jnp.arange(p)[None, :]   # (L, p)
        windows = xp[:, idx, :]                                  # (B, L, p, C)
        trend = jnp.mean(windows, axis=2)                        # AvgPool1d(k=p, s=1)
        trends.append(trend)
        seasonals.append(x - trend)
    return trends, seasonals


def _check(x, periods, **kw):
    trends, seasonals = stl_decompose_forward(x, periods, **kw)
    trends = [jax.block_until_ready(t) for t in trends]
    seasonals = [jax.block_until_ready(s) for s in seasonals]
    ref_t, ref_s = _ref_stl(x, periods)
    for i in range(len(periods)):
        assert trends[i].shape == x.shape, trends[i].shape
        assert seasonals[i].shape == x.shape, seasonals[i].shape
        assert jnp.allclose(trends[i], ref_t[i], rtol=1e-5, atol=1e-5), (
            i, float(jnp.max(jnp.abs(trends[i] - ref_t[i]))))
        assert jnp.allclose(seasonals[i], ref_s[i], rtol=1e-5, atol=1e-5), (
            i, float(jnp.max(jnp.abs(seasonals[i] - ref_s[i]))))


# ----------------------------------------------------------------------------- main
if __name__ == "__main__":
    key = jax.random.PRNGKey(0)

    # Primary small case (mirrors the module defaults).
    x1 = jax.random.normal(key, (2, 16, 8), jnp.float32)
    _check(x1, [4, 6])

    # Exercise lane splitting + time tiling + non-divisible L at small scale.
    x2 = jax.random.normal(jax.random.fold_in(key, 1), (4, 40, 48), jnp.float32)
    _check(x2, [3, 5, 24], max_time_tile=16)

    print("KERNEL_OK")
</pallas_src>

<mosaic_0001>
module attributes {stable_mosaic.version = 11 : i64} {
  func.func @_stl_kernel(%arg0: i32, %arg1: i32, %arg2: memref<26x128xf32, #tpu.memory_space<vmem>>, %arg3: memref<2x16x128xf32, #tpu.memory_space<vmem>>, %arg4: memref<2x16x128xf32, #tpu.memory_space<vmem>>) attributes {dimension_semantics = [#tpu.dimension_semantics<parallel>, #tpu.dimension_semantics<arbitrary>], iteration_bounds = array<i64: 1, 1>, scalar_prefetch = 0 : i64, scratch_operands = 0 : i64, tpu.core_type = #tpu.core_type<tc>, window_params = [{transform_indices = @transform_0, window_bounds = array<i64: 26, 128>}, {transform_indices = @transform_1, window_bounds = array<i64: 2, 16, 128>}, {transform_indices = @transform_2, window_bounds = array<i64: 2, 16, 128>}]} {
    %c16_i32 = arith.constant 16 : i32
    %0 = arith.muli %arg1, %c16_i32 : i32
    %c8_i32 = arith.constant 8 : i32
    %1 = arith.addi %0, %c8_i32 : i32
    %2 = tpu.assume_multiple %1, 8 : i32
    %c0_i32 = arith.constant 0 : i32
    %3 = arith.addi %2, %c0_i32 : i32
    %4 = arith.index_cast %3 : i32 to index
    %c0 = arith.constant 0 : index
    %5 = vector.load %arg2[%4, %c0] : memref<26x128xf32, #tpu.memory_space<vmem>>, vector<16x128xf32>
    %c-2_i32 = arith.constant -2 : i32
    %6 = arith.addi %2, %c-2_i32 : i32
    %7 = arith.index_cast %6 : i32 to index
    %c0_0 = arith.constant 0 : index
    %8 = vector.load %arg2[%7, %c0_0] : memref<26x128xf32, #tpu.memory_space<vmem>>, vector<16x128xf32>
    %c-1_i32 = arith.constant -1 : i32
    %9 = arith.addi %2, %c-1_i32 : i32
    %10 = arith.index_cast %9 : i32 to index
    %c0_1 = arith.constant 0 : index
    %11 = vector.load %arg2[%10, %c0_1] : memref<26x128xf32, #tpu.memory_space<vmem>>, vector<16x128xf32>
    %12 = arith.addf %8, %11 : vector<16x128xf32>
    %13 = arith.addf %12, %5 : vector<16x128xf32>
    %c1_i32 = arith.constant 1 : i32
    %14 = arith.addi %2, %c1_i32 : i32
    %15 = arith.index_cast %14 : i32 to index
    %c0_2 = arith.constant 0 : index
    %16 = vector.load %arg2[%15, %c0_2] : memref<26x128xf32, #tpu.memory_space<vmem>>, vector<16x128xf32>
    %17 = arith.addf %13, %16 : vector<16x128xf32>
    %cst = arith.constant 2.500000e-01 : f32
    %18 = vector.broadcast %cst : f32 to vector<16x128xf32>
    %19 = arith.mulf %17, %18 : vector<16x128xf32>
    %c0_3 = arith.constant 0 : index
    %c0_4 = arith.constant 0 : index
    %c0_5 = arith.constant 0 : index
    %20 = vector.load %arg3[%c0_3, %c0_4, %c0_5] : memref<2x16x128xf32, #tpu.memory_space<vmem>>, vector<1x16x128xf32>
    %21 = vector.shape_cast %20 : vector<1x16x128xf32> to vector<16x128xf32>
    %22 = vector.shape_cast %19 : vector<16x128xf32> to vector<1x16x128xf32>
    tpu.vector_store %arg3[%c0_3, %c0_4, %c0_5], %22 {strides = array<i32>} : memref<2x16x128xf32, #tpu.memory_space<vmem>>, vector<1x16x128xf32>,
    %23 = arith.subf %5, %19 : vector<16x128xf32>
    %c0_6 = arith.constant 0 : index
    %c0_7 = arith.constant 0 : index
    %c0_8 = arith.constant 0 : index
    %24 = vector.load %arg4[%c0_6, %c0_7, %c0_8] : memref<2x16x128xf32, #tpu.memory_space<vmem>>, vector<1x16x128xf32>
    %25 = vector.shape_cast %24 : vector<1x16x128xf32> to vector<16x128xf32>
    %26 = vector.shape_cast %23 : vector<16x128xf32> to vector<1x16x128xf32>
    tpu.vector_store %arg4[%c0_6, %c0_7, %c0_8], %26 {strides = array<i32>} : memref<2x16x128xf32, #tpu.memory_space<vmem>>, vector<1x16x128xf32>,
    %c-3_i32 = arith.constant -3 : i32
    %27 = arith.addi %2, %c-3_i32 : i32
    %28 = arith.index_cast %27 : i32 to index
    %c0_9 = arith.constant 0 : index
    %29 = vector.load %arg2[%28, %c0_9] : memref<26x128xf32, #tpu.memory_space<vmem>>, vector<16x128xf32>
    %30 = arith.addf %17, %29 : vector<16x128xf32>
    %c2_i32 = arith.constant 2 : i32
    %31 = arith.addi %2, %c2_i32 : i32
    %32 = arith.index_cast %31 : i32 to index
    %c0_10 = arith.constant 0 : index
    %33 = vector.load %arg2[%32, %c0_10] : memref<26x128xf32, #tpu.memory_space<vmem>>, vector<16x128xf32>
    %34 = arith.addf %30, %33 : vector<16x128xf32>
    %cst_11 = arith.constant 0.166666672 : f32
    %35 = vector.broadcast %cst_11 : f32 to vector<16x128xf32>
    %36 = arith.mulf %34, %35 : vector<16x128xf32>
    %c1 = arith.constant 1 : index
    %c0_12 = arith.constant 0 : index
    %c0_13 = arith.constant 0 : index
    %37 = vector.load %arg3[%c1, %c0_12, %c0_13] : memref<2x16x128xf32, #tpu.memory_space<vmem>>, vector<1x16x128xf32>
    %38 = vector.shape_cast %37 : vector<1x16x128xf32> to vector<16x128xf32>
    %39 = vector.shape_cast %36 : vector<16x128xf32> to vector<1x16x128xf32>
    tpu.vector_store %arg3[%c1, %c0_12, %c0_13], %39 {strides = array<i32>} : memref<2x16x128xf32, #tpu.memory_space<vmem>>, vector<1x16x128xf32>,
    %40 = arith.subf %5, %36 : vector<16x128xf32>
    %c1_14 = arith.constant 1 : index
    %c0_15 = arith.constant 0 : index
    %c0_16 = arith.constant 0 : index
    %41 = vector.load %arg4[%c1_14, %c0_15, %c0_16] : memref<2x16x128xf32, #tpu.memory_space<vmem>>, vector<1x16x128xf32>
    %42 = vector.shape_cast %41 : vector<1x16x128xf32> to vector<16x128xf32>
    %43 = vector.shape_cast %40 : vector<16x128xf32> to vector<1x16x128xf32>
    tpu.vector_store %arg4[%c1_14, %c0_15, %c0_16], %43 {strides = array<i32>} : memref<2x16x128xf32, #tpu.memory_space<vmem>>, vector<1x16x128xf32>,
    return
  }
  func.func @transform_0(%arg0: i32, %arg1: i32) -> (i32, i32) {
    %c0_i32 = arith.constant 0 : i32
    %c0_i32_0 = arith.constant 0 : i32
    return %c0_i32, %arg0 : i32, i32
  }
  func.func @transform_1(%arg0: i32, %arg1: i32) -> (i32, i32, i32) {
    %c0_i32 = arith.constant 0 : i32
    %c0_i32_0 = arith.constant 0 : i32
    return %c0_i32, %arg1, %arg0 : i32, i32, i32
  }
  func.func @transform_2(%arg0: i32, %arg1: i32) -> (i32, i32, i32) {
    %c0_i32 = arith.constant 0 : i32
    %c0_i32_0 = arith.constant 0 : i32
    return %c0_i32, %arg1, %arg0 : i32, i32, i32
  }
}

</mosaic_0001>

<bundles_post_ra>
// kernel: tpu_custom_call.1
= control target key start
LH: loop header
LB: loop body
LE: loop exit
PB: predicated region body
PF: predicated region fallthrough
CT: control target
= control target key end

     0   :  { %8 = vsyncpa [#allocation3], 0  ;;  %s245_s0 = inlined_call_operand.hbm [shape: f32[26,128], index: 0, kind: input, shape index: {}]   ;;  %s246_s1 = inlined_call_operand.hbm [shape: f32[2,16,128], index: 1, kind: output, shape index: {0}]   ;;  %s247_s2 = inlined_call_operand.hbm [shape: f32[2,16,128], index: 2, kind: output, shape index: {1}]  }
   0x1   :  { %9 = vsyncpa [#allocation4], 0 }
   0x2   :  { %10 = vsyncpa [#allocation7], 0  ;;  %s15_s11 = sshll.u32 %s245_s0, 4  ;;  %s207_s12 = smov [#allocation2]   ;;  %s16_s11 = int_to_ptr.hbm [resolvable:$true] %s15_s11 }
   0x3   :  { %s17_s13 = sshll.u32 %s207_s12, 4  ;;  %s208_s14 = smov 128   ;;  %s18_s13 = int_to_ptr.vmem [resolvable:$true] %s17_s13 }
   0x4   :  { %s209_s15 = smov 8  }
   0x5   :  { %23 = dma.hbm_to_vmem [thread:$0]  %s16_s11, 512, %s18_s13, [#allocation3], %s208_s14, %s208_s14, %s209_s15  }
   0x6   :  { %201 = dma.done.wait [#allocation3], 512  }
   0x7   :  { %202 = vsyncadd [#allocation3], 4294966784  ;;  %v31_v0 = vld [vmem:[#allocation2 + $0x8] sm:$0xff]  ;;  %v32_v6 = vld [vmem:[#allocation2 + $0x10] sm:$0xff]  ;;  %s210_s0 = smov [#allocation5]   ;;  %s87_s19 = sshll.u32 %s246_s1, 4  ;;  %s88_s19 = int_to_ptr.hbm [resolvable:$true] %s87_s19 }
   0x8   :  { %v35_v1 = vld [vmem:[#allocation2 + $0x6] sm:$0xff]  ;;  %v36_v4 = vld [vmem:[#allocation2 + $0xe] sm:$0xff]  ;;  %s85_s16 = sshll.u32 %s210_s0, 4  ;;  %s211_s20 = smov [#allocation6]   ;;  %s86_s16 = int_to_ptr.vmem [resolvable:$true] %s85_s16 }
   0x9   :  { %v39_v2 = vld [vmem:[#allocation2 + $0x7] sm:$0xff]  ;;  %v40_v7 = vld [vmem:[#allocation2 + $0xf] sm:$0xff]  ;;  %s98_s21 = sshll.u32 %s211_s20, 4  ;;  %s100_s24 = sshll.u32 %s247_s2, 4  ;;  %s99_s21 = int_to_ptr.vmem [resolvable:$true] %s98_s21  ;;  %s101_s24 = int_to_ptr.hbm [resolvable:$true] %s100_s24 }
   0xa   :  { %v41_v3 = vadd.f32 %v39_v2, %v35_v1  ;;  %v47_v5 = vld [vmem:[#allocation2 + $0x9] sm:$0xff]  ;;  %v42_v9 = vadd.f32 %v40_v7, %v36_v4  ;;  %v48_v10 = vld [vmem:[#allocation2 + $0x11] sm:$0xff] }
   0xb   :  { %v61_v11 = vld [vmem:[#allocation2 + $0x5] sm:$0xff]  ;;  %v62_v15 = vld [vmem:[#allocation2 + $0xd] sm:$0xff] }
   0xc   :  { %v43_v8 = vadd.f32 %v41_v3, %v31_v0  ;;  %v44_v13 = vadd.f32 %v42_v9, %v32_v6  ;;  %v67_v14 = vld [vmem:[#allocation2 + $0xa] sm:$0xff]  ;;  %v68_v19 = vld [vmem:[#allocation2 + $0x12] sm:$0xff] }
   0xe   :  { %v49_v12 = vadd.f32 %v47_v5, %v43_v8  ;;  %v50_v17 = vadd.f32 %v48_v10, %v44_v13 }
  0x10   :  { %v51_v16 = vmul.f32 0.25, %v49_v12  ;;  %v63_v18 = vadd.f32 %v61_v11, %v49_v12  ;;  %v52_v20 = vmul.f32 0.25, %v50_v17  ;;  %v64_v23 = vadd.f32 %v62_v15, %v50_v17 }
  0x12   :  { %53 = vst [vmem:[#allocation5] sm:$0xff] %v51_v16  ;;  %v55_v21 = vsub.f32 %v31_v0, %v51_v16  ;;  %v69_v22 = vadd.f32 %v67_v14, %v63_v18  ;;  %v56_v24 = vsub.f32 %v32_v6, %v52_v20  ;;  %v70_v26 = vadd.f32 %v68_v19, %v64_v23 }
  0x13   :  { %54 = vst [vmem:[#allocation5 + $0x8] sm:$0xff] %v52_v20 }
  0x14   :  { %v71_v25 = vmul.f32 0.16666667, %v69_v22  ;;  %57 = vst [vmem:[#allocation6] sm:$0xff] %v55_v21  ;;  %v72_v27 = vmul.f32 0.16666667, %v70_v26 }
  0x15   :  { %58 = vst [vmem:[#allocation6 + $0x8] sm:$0xff] %v56_v24 }
  0x16   :  { %v76_v28 = vsub.f32 %v31_v0, %v71_v25  ;;  %74 = vst [vmem:[#allocation5 + $0x10] sm:$0xff] %v71_v25  ;;  %v77_v29 = vsub.f32 %v32_v6, %v72_v27 }
  0x17   :  { %75 = vst [vmem:[#allocation5 + $0x18] sm:$0xff] %v72_v27 }
  0x18   :  { %79 = vst [vmem:[#allocation6 + $0x10] sm:$0xff] %v76_v28  ;;  %93 = dma.vmem_to_hbm [thread:$0]  %s86_s16, 512, %s88_s19, [#allocation4], %s208_s14, %s208_s14, %s209_s15  }
  0x19   :  { %80 = vst [vmem:[#allocation6 + $0x18] sm:$0xff] %v77_v29 }
  0x1a   :  { %106 = dma.vmem_to_hbm [thread:$0]  %s99_s21, 512, %s101_s24, [#allocation7], %s208_s14, %s208_s14, %s209_s15  }
  0x1b   :  { %203 = dma.done.wait [#allocation4], 512  }
  0x1c   :  { %204 = vsyncadd [#allocation4], 4294966784 }
  0x1d   :  { %205 = dma.done.wait [#allocation7], 512  }
  0x1e   :  { %206 = vsyncadd [#allocation7], 4294966784 }
  0x1f   :  { %115 = vsyncpa [#allocation3], 1 }
  0x20   :  { %116 = vsyncpa [#allocation4], 1 }
  0x21   :  { %117 = vsyncpa [#allocation7], 1 }

</bundles_post_ra>
